<compile_context>
chip_gen: v7x
topology: tpu7x:2x2x1
jax: 0.10.0
libtpu: 0.0.40
codegen_flags: <defaults>
</compile_context>

<pallas_src>
import functools
import math

import jax
import jax.numpy as jnp
from jax import lax
from jax.experimental import pallas as pl
from jax.experimental.pallas import tpu as pltpu

# Prefer the current name; fall back only if running on an older JAX.
_CompilerParams = getattr(pltpu, "CompilerParams", None) or getattr(
    pltpu, "TPUCompilerParams")


# ----------------------------------------------------------------------------
# Kernel: full encoder stack.  Grid = (B, L); one batch element / one layer
# per grid step.  x is carried across the layer axis in a VMEM scratch.
# ----------------------------------------------------------------------------
def encoder_stack_kernel(emb_ref, pe_ref, wqkv_ref, wo_ref,
                         g1_ref, be1_ref, w1_ref, bf1_ref,
                         w2_ref, bf2_ref, g2_ref, be2_ref,
                         out_ref, x_scratch,
                         *, num_heads, d_k, d_model, scale):
    layer = pl.program_id(1)
    D = d_model

    # ---- fused "embedding * sqrt(d_model) + positional encoding" ----------
    @pl.when(layer == 0)
    def _():
        x_scratch[...] = emb_ref[0] * scale + pe_ref[...]

    x = x_scratch[...]                                   # [S, D] float32
    xb = x.astype(jnp.bfloat16)

    # ---- fused QKV projection: one MXU matmul ------------------------------
    qkv = jnp.dot(xb, wqkv_ref[0],
                  preferred_element_type=jnp.float32)    # [S, 3D] f32

    # head-batched views [H, S, d_k] (static slices + major-dim stack)
    def heads(offset):
        return jnp.stack(
            [qkv[:, offset + h * d_k: offset + (h + 1) * d_k]
             for h in range(num_heads)], axis=0)

    q = heads(0).astype(jnp.bfloat16)                    # [H, S, d_k]
    k = heads(D).astype(jnp.bfloat16)
    v = heads(2 * D).astype(jnp.bfloat16)

    # scores[h,q,k] = sum_d q[h,q,d] * k[h,k,d]   (batched over heads, no .T)
    scores = lax.dot_general(
        q, k, (((2,), (2,)), ((0,), (0,))),
        preferred_element_type=jnp.float32) * (1.0 / math.sqrt(d_k))

    # f32 softmax
    scores = scores - jnp.max(scores, axis=-1, keepdims=True)
    e = jnp.exp(scores)
    attn = e / jnp.sum(e, axis=-1, keepdims=True)        # [H, S, S]

    # ctx[h,q,d] = sum_k attn[h,q,k] * v[h,k,d]
    ctx = lax.dot_general(
        attn.astype(jnp.bfloat16), v, (((2,), (1,)), ((0,), (0,))),
        preferred_element_type=jnp.float32)              # [H, S, d_k]

    # output projection folded per head (Wo stored [H, d_k, D]); sum over heads
    part = lax.dot_general(
        ctx.astype(jnp.bfloat16), wo_ref[0], (((2,), (1,)), ((0,), (0,))),
        preferred_element_type=jnp.float32)              # [H, S, D]
    attn_out = jnp.sum(part, axis=0)                     # [S, D]

    def layer_norm(y, gamma, beta, eps=1e-5):
        mu = jnp.mean(y, axis=-1, keepdims=True)
        var = jnp.mean((y - mu) ** 2, axis=-1, keepdims=True)
        return (y - mu) * lax.rsqrt(var + eps) * gamma + beta

    out1 = layer_norm(x + attn_out, g1_ref[0], be1_ref[0])

    # ---- position-wise feed-forward ----------------------------------------
    h1 = jnp.maximum(
        jnp.dot(out1.astype(jnp.bfloat16), w1_ref[0],
                preferred_element_type=jnp.float32) + bf1_ref[0], 0.0)
    ffn = (jnp.dot(h1.astype(jnp.bfloat16), w2_ref[0],
                   preferred_element_type=jnp.float32) + bf2_ref[0])

    new_x = layer_norm(out1 + ffn, g2_ref[0], be2_ref[0])

    # carry activation to the next layer; emit only after the last layer
    x_scratch[...] = new_x

    @pl.when(layer == pl.num_programs(1) - 1)
    def _():
        out_ref[0] = new_x


# ----------------------------------------------------------------------------
# Wrapper
# ----------------------------------------------------------------------------
def encoder_forward(token_ids, emb_table, pe_table, params, d_model, num_heads):
    B, S = token_ids.shape
    D = d_model
    H = num_heads
    d_k = D // H
    L = params["wqkv"].shape[0]

    # embedding gather is plain-JAX glue (scale + PE happen inside the kernel)
    emb = jnp.take(emb_table, token_ids, axis=0)            # [B, S, D] f32
    pe = pe_table[:S]                                       # [S, D]

    # bf16 weight storage for the MXU; Wo pre-split per head: [L, H, d_k, D]
    wqkv = params["wqkv"].astype(jnp.bfloat16)              # [L, D, 3D]
    wo_h = params["wo"].reshape(L, H, d_k, D).astype(jnp.bfloat16)
    w1 = params["w1"].astype(jnp.bfloat16)                  # [L, D, dff]
    w2 = params["w2"].astype(jnp.bfloat16)                  # [L, dff, D]

    def per_layer_spec(arr):
        nz = arr.ndim - 1
        return pl.BlockSpec((1,) + arr.shape[1:],
                            lambda b, l, _nz=nz: (l,) + (0,) * _nz)

    kernel = functools.partial(encoder_stack_kernel, num_heads=H, d_k=d_k,
                               d_model=D, scale=math.sqrt(D))

    return pl.pallas_call(
        kernel,
        out_shape=jax.ShapeDtypeStruct((B, S, D), jnp.float32),
        grid_spec=pltpu.PrefetchScalarGridSpec(
            num_scalar_prefetch=0,
            grid=(B, L),
            in_specs=[
                pl.BlockSpec((1, S, D), lambda b, l: (b, 0, 0)),   # embeddings
                pl.BlockSpec((S, D), lambda b, l: (0, 0)),         # pos encoding
                per_layer_spec(wqkv), per_layer_spec(wo_h),
                per_layer_spec(params["g1"]), per_layer_spec(params["be1"]),
                per_layer_spec(w1), per_layer_spec(params["bf1"]),
                per_layer_spec(w2), per_layer_spec(params["bf2"]),
                per_layer_spec(params["g2"]), per_layer_spec(params["be2"]),
            ],
            out_specs=pl.BlockSpec((1, S, D), lambda b, l: (b, 0, 0)),
            scratch_shapes=[pltpu.VMEM((S, D), jnp.float32)],
        ),
        compiler_params=_CompilerParams(
            dimension_semantics=("parallel", "arbitrary")),
    )(emb, pe, wqkv, wo_h,
      params["g1"], params["be1"], w1, params["bf1"],
      w2, params["bf2"], params["g2"], params["be2"])


# ----------------------------------------------------------------------------
# Parameter init + positional encoding table (deterministic, plain JAX)
# ----------------------------------------------------------------------------
def make_positional_encoding(max_length, d_model):
    pos = jnp.arange(max_length, dtype=jnp.float32)[:, None]
    div = jnp.exp(jnp.arange(0, d_model, 2, dtype=jnp.float32)
                  * (-math.log(10000.0) / d_model))
    pe = jnp.zeros((max_length, d_model), jnp.float32)
    pe = pe.at[:, 0::2].set(jnp.sin(pos * div))
    pe = pe.at[:, 1::2].set(jnp.cos(pos * div))
    return pe


def init_params(key, vocab_size, d_model, num_layers, dff):
    keys = jax.random.split(key, 1 + num_layers)
    emb_table = jax.random.normal(keys[0], (vocab_size, d_model),
                                  jnp.float32) * 0.02
    per_layer = []
    for li in range(num_layers):
        ks = jax.random.split(keys[1 + li], 8)
        s = 1.0 / math.sqrt(d_model)
        s2 = 1.0 / math.sqrt(dff)
        wq = jax.random.uniform(ks[0], (d_model, d_model), jnp.float32, -s, s)
        wk = jax.random.uniform(ks[1], (d_model, d_model), jnp.float32, -s, s)
        wv = jax.random.uniform(ks[2], (d_model, d_model), jnp.float32, -s, s)
        per_layer.append(dict(
            wqkv=jnp.concatenate([wq, wk, wv], axis=1),          # [D, 3D]
            wo=jax.random.uniform(ks[3], (d_model, d_model), jnp.float32, -s, s),
            g1=jnp.ones((1, d_model), jnp.float32),
            be1=jnp.zeros((1, d_model), jnp.float32),
            w1=jax.random.uniform(ks[4], (d_model, dff), jnp.float32, -s, s),
            bf1=jax.random.uniform(ks[5], (1, dff), jnp.float32, -s, s),
            w2=jax.random.uniform(ks[6], (dff, d_model), jnp.float32, -s2, s2),
            bf2=jax.random.uniform(ks[7], (1, d_model), jnp.float32, -s2, s2),
            g2=jnp.ones((1, d_model), jnp.float32),
            be2=jnp.zeros((1, d_model), jnp.float32),
        ))
    params = {k: jnp.stack([p[k] for p in per_layer], axis=0)
              for k in per_layer[0]}
    return emb_table, params


# ----------------------------------------------------------------------------
# Pure-JAX reference (f32 math).  Uses the same bf16-stored matmul weights the
# kernel uses (dequantized to f32), so the comparison isolates the kernel's
# arithmetic rather than the bf16 weight-storage choice.
# ----------------------------------------------------------------------------
def encoder_reference(token_ids, emb_table, pe_table, params, d_model, num_heads):
    B, S = token_ids.shape
    H = num_heads
    d_k = d_model // H
    L = params["wqkv"].shape[0]

    def deq(w):
        return w.astype(jnp.bfloat16).astype(jnp.float32)

    def ln(y, g, b, eps=1e-5):
        mu = y.mean(-1, keepdims=True)
        var = ((y - mu) ** 2).mean(-1, keepdims=True)
        return (y - mu) / jnp.sqrt(var + eps) * g + b

    x = jnp.take(emb_table, token_ids, axis=0) * math.sqrt(d_model) + pe_table[:S]
    for li in range(L):
        wqkv, wo = deq(params["wqkv"][li]), deq(params["wo"][li])
        w1, w2 = deq(params["w1"][li]), deq(params["w2"][li])
        g1, be1 = params["g1"][li], params["be1"][li]
        bf1, bf2 = params["bf1"][li], params["bf2"][li]
        g2, be2 = params["g2"][li], params["be2"][li]

        q = (x @ wqkv[:, :d_model]).reshape(B, S, H, d_k).transpose(0, 2, 1, 3)
        k = (x @ wqkv[:, d_model:2 * d_model]).reshape(B, S, H, d_k).transpose(0, 2, 1, 3)
        v = (x @ wqkv[:, 2 * d_model:]).reshape(B, S, H, d_k).transpose(0, 2, 1, 3)
        sc = jnp.einsum("bhqd,bhkd->bhqk", q, k) / math.sqrt(d_k)
        attn = jax.nn.softmax(sc, axis=-1)
        ao = jnp.einsum("bhqk,bhkd->bhqd", attn, v).transpose(0, 2, 1, 3)
        ao = ao.reshape(B, S, d_model) @ wo
        out1 = ln(x + ao, g1, be1)
        ffn = jnp.maximum(out1 @ w1 + bf1, 0.0) @ w2 + bf2
        x = ln(out1 + ffn, g2, be2)
    return x


# ----------------------------------------------------------------------------
if __name__ == "__main__":
    # small, forward-consistent shapes
    vocab_size, d_model, num_layers, num_heads = 50, 32, 2, 4
    dff, max_length = 64, 64
    B, S = 2, 8

    key = jax.random.PRNGKey(0)
    k_tok, k_par = jax.random.split(key)
    token_ids = jax.random.randint(k_tok, (B, S), 0, vocab_size, jnp.int32)

    emb_table, params = init_params(k_par, vocab_size, d_model, num_layers, dff)
    pe_table = make_positional_encoding(max_length, d_model)

    out = encoder_forward(token_ids, emb_table, pe_table, params,
                          d_model, num_heads)
    out = jax.block_until_ready(out)

    ref = encoder_reference(token_ids, emb_table, pe_table, params,
                            d_model, num_heads)
    assert out.shape == (B, S, d_model)
    assert jnp.allclose(out, ref, atol=2e-2, rtol=2e-2), (
        "mismatch vs reference: max abs err = %g"
        % float(jnp.max(jnp.abs(out - ref))))

    # TODO(synk): dropout is identity (eval-mode); training-mode dropout would
    # need pltpu.prng_* inside the kernel.  No src mask (mask=None path only).
    print("KERNEL_OK")
</pallas_src>

<mosaic_0001>
module attributes {stable_mosaic.version = 11 : i64} {
  func.func @encoder_stack_kernel(%arg0: i32, %arg1: i32, %arg2: memref<1x8x32xf32, #tpu.memory_space<vmem>>, %arg3: memref<8x32xf32, #tpu.memory_space<vmem>>, %arg4: memref<1x32x96xbf16, #tpu.memory_space<vmem>>, %arg5: memref<1x4x8x32xbf16, #tpu.memory_space<vmem>>, %arg6: memref<1x1x32xf32, #tpu.memory_space<vmem>>, %arg7: memref<1x1x32xf32, #tpu.memory_space<vmem>>, %arg8: memref<1x32x64xbf16, #tpu.memory_space<vmem>>, %arg9: memref<1x1x64xf32, #tpu.memory_space<vmem>>, %arg10: memref<1x64x32xbf16, #tpu.memory_space<vmem>>, %arg11: memref<1x1x32xf32, #tpu.memory_space<vmem>>, %arg12: memref<1x1x32xf32, #tpu.memory_space<vmem>>, %arg13: memref<1x1x32xf32, #tpu.memory_space<vmem>>, %arg14: memref<1x8x32xf32, #tpu.memory_space<vmem>>, %arg15: memref<8x32xf32, #tpu.memory_space<vmem>>) attributes {dimension_semantics = [#tpu.dimension_semantics<parallel>, #tpu.dimension_semantics<arbitrary>], iteration_bounds = array<i64: 2, 2>, scalar_prefetch = 0 : i64, scratch_operands = 1 : i64, tpu.core_type = #tpu.core_type<tc>, window_params = [{transform_indices = @transform_0, window_bounds = array<i64: 1, 8, 32>}, {pipeline_mode = #tpu.pipeline_mode<synchronous>, transform_indices = @transform_1, window_bounds = array<i64: 8, 32>}, {transform_indices = @transform_2, window_bounds = array<i64: 1, 32, 96>}, {transform_indices = @transform_3, window_bounds = array<i64: 1, 4, 8, 32>}, {transform_indices = @transform_4, window_bounds = array<i64: 1, 1, 32>}, {transform_indices = @transform_5, window_bounds = array<i64: 1, 1, 32>}, {transform_indices = @transform_6, window_bounds = array<i64: 1, 32, 64>}, {transform_indices = @transform_7, window_bounds = array<i64: 1, 1, 64>}, {transform_indices = @transform_8, window_bounds = array<i64: 1, 64, 32>}, {transform_indices = @transform_9, window_bounds = array<i64: 1, 1, 32>}, {transform_indices = @transform_10, window_bounds = array<i64: 1, 1, 32>}, {transform_indices = @transform_11, window_bounds = array<i64: 1, 1, 32>}, {transform_indices = @transform_12, window_bounds = array<i64: 1, 8, 32>}]} {
    %c0_i32 = arith.constant 0 : i32
    %0 = arith.cmpi eq, %arg1, %c0_i32 : i32
    %1 = arith.extui %0 : i1 to i32
    %c0_i32_0 = arith.constant 0 : i32
    %2 = arith.cmpi ne, %1, %c0_i32_0 : i32
    scf.if %2 {
      %c0_56 = arith.constant 0 : index
      %c0_57 = arith.constant 0 : index
      %c0_58 = arith.constant 0 : index
      %133 = vector.load %arg2[%c0_56, %c0_57, %c0_58] : memref<1x8x32xf32, #tpu.memory_space<vmem>>, vector<1x8x32xf32>
      %134 = vector.shape_cast %133 : vector<1x8x32xf32> to vector<8x32xf32>
      %cst_59 = arith.constant 5.65685415 : f32
      %135 = vector.broadcast %cst_59 : f32 to vector<8x32xf32>
      %136 = arith.mulf %134, %135 : vector<8x32xf32>
      %c0_60 = arith.constant 0 : index
      %c0_61 = arith.constant 0 : index
      %137 = vector.load %arg3[%c0_60, %c0_61] : memref<8x32xf32, #tpu.memory_space<vmem>>, vector<8x32xf32>
      %138 = arith.addf %136, %137 : vector<8x32xf32>
      %c0_62 = arith.constant 0 : index
      %c0_63 = arith.constant 0 : index
      %139 = vector.load %arg15[%c0_62, %c0_63] : memref<8x32xf32, #tpu.memory_space<vmem>>, vector<8x32xf32>
      tpu.vector_store %arg15[%c0_62, %c0_63], %138 {strides = array<i32>} : memref<8x32xf32, #tpu.memory_space<vmem>>, vector<8x32xf32>,
    } else {
    }
    %c0 = arith.constant 0 : index
    %c0_1 = arith.constant 0 : index
    %3 = vector.load %arg15[%c0, %c0_1] : memref<8x32xf32, #tpu.memory_space<vmem>>, vector<8x32xf32>
    %4 = arith.truncf %3 : vector<8x32xf32> to vector<8x32xbf16>
    %c0_2 = arith.constant 0 : index
    %c0_3 = arith.constant 0 : index
    %c0_4 = arith.constant 0 : index
    %5 = vector.load %arg4[%c0_2, %c0_3, %c0_4] : memref<1x32x96xbf16, #tpu.memory_space<vmem>>, vector<1x32x96xbf16>
    %6 = vector.shape_cast %5 : vector<1x32x96xbf16> to vector<32x96xbf16>
    %cst = arith.constant dense<0.000000e+00> : vector<8x96xf32>
    %7 = tpu.matmul %4, %6, %cst {dimension_numbers = #tpu.dot_dimension_numbers<[1], [0], [0], [1], [0, 0, 1, 1], [], []>} : vector<8x32xbf16>, vector<32x96xbf16>, vector<8x96xf32> -> vector<8x96xf32>
    %8 = vector.extract_strided_slice %7 {offsets = [0, 0], sizes = [8, 8], strides = [1, 1]} : vector<8x96xf32> to vector<8x8xf32>
    %9 = vector.extract_strided_slice %7 {offsets = [0, 8], sizes = [8, 8], strides = [1, 1]} : vector<8x96xf32> to vector<8x8xf32>
    %10 = vector.extract_strided_slice %7 {offsets = [0, 16], sizes = [8, 8], strides = [1, 1]} : vector<8x96xf32> to vector<8x8xf32>
    %11 = vector.extract_strided_slice %7 {offsets = [0, 24], sizes = [8, 8], strides = [1, 1]} : vector<8x96xf32> to vector<8x8xf32>
    %12 = vector.shape_cast %8 : vector<8x8xf32> to vector<1x8x8xf32>
    %13 = vector.shape_cast %9 : vector<8x8xf32> to vector<1x8x8xf32>
    %14 = vector.shape_cast %10 : vector<8x8xf32> to vector<1x8x8xf32>
    %15 = vector.shape_cast %11 : vector<8x8xf32> to vector<1x8x8xf32>
    %16 = tpu.concatenate %12, %13, %14, %15 in 0 : vector<1x8x8xf32>, vector<1x8x8xf32>, vector<1x8x8xf32>, vector<1x8x8xf32> -> vector<4x8x8xf32>
    %17 = arith.truncf %16 : vector<4x8x8xf32> to vector<4x8x8xbf16>
    %18 = vector.extract_strided_slice %7 {offsets = [0, 32], sizes = [8, 8], strides = [1, 1]} : vector<8x96xf32> to vector<8x8xf32>
    %19 = vector.extract_strided_slice %7 {offsets = [0, 40], sizes = [8, 8], strides = [1, 1]} : vector<8x96xf32> to vector<8x8xf32>
    %20 = vector.extract_strided_slice %7 {offsets = [0, 48], sizes = [8, 8], strides = [1, 1]} : vector<8x96xf32> to vector<8x8xf32>
    %21 = vector.extract_strided_slice %7 {offsets = [0, 56], sizes = [8, 8], strides = [1, 1]} : vector<8x96xf32> to vector<8x8xf32>
    %22 = vector.shape_cast %18 : vector<8x8xf32> to vector<1x8x8xf32>
    %23 = vector.shape_cast %19 : vector<8x8xf32> to vector<1x8x8xf32>
    %24 = vector.shape_cast %20 : vector<8x8xf32> to vector<1x8x8xf32>
    %25 = vector.shape_cast %21 : vector<8x8xf32> to vector<1x8x8xf32>
    %26 = tpu.concatenate %22, %23, %24, %25 in 0 : vector<1x8x8xf32>, vector<1x8x8xf32>, vector<1x8x8xf32>, vector<1x8x8xf32> -> vector<4x8x8xf32>
    %27 = arith.truncf %26 : vector<4x8x8xf32> to vector<4x8x8xbf16>
    %28 = vector.extract_strided_slice %7 {offsets = [0, 64], sizes = [8, 8], strides = [1, 1]} : vector<8x96xf32> to vector<8x8xf32>
    %29 = vector.extract_strided_slice %7 {offsets = [0, 72], sizes = [8, 8], strides = [1, 1]} : vector<8x96xf32> to vector<8x8xf32>
    %30 = vector.extract_strided_slice %7 {offsets = [0, 80], sizes = [8, 8], strides = [1, 1]} : vector<8x96xf32> to vector<8x8xf32>
    %31 = vector.extract_strided_slice %7 {offsets = [0, 88], sizes = [8, 8], strides = [1, 1]} : vector<8x96xf32> to vector<8x8xf32>
    %32 = vector.shape_cast %28 : vector<8x8xf32> to vector<1x8x8xf32>
    %33 = vector.shape_cast %29 : vector<8x8xf32> to vector<1x8x8xf32>
    %34 = vector.shape_cast %30 : vector<8x8xf32> to vector<1x8x8xf32>
    %35 = vector.shape_cast %31 : vector<8x8xf32> to vector<1x8x8xf32>
    %36 = tpu.concatenate %32, %33, %34, %35 in 0 : vector<1x8x8xf32>, vector<1x8x8xf32>, vector<1x8x8xf32>, vector<1x8x8xf32> -> vector<4x8x8xf32>
    %37 = arith.truncf %36 : vector<4x8x8xf32> to vector<4x8x8xbf16>
    %cst_5 = arith.constant dense<0.000000e+00> : vector<4x8x8xf32>
    %38 = tpu.matmul %17, %27, %cst_5 {dimension_numbers = #tpu.dot_dimension_numbers<[2], [2], [1], [1], [0, 0, 0, 1, 1, 1], [0], [0]>} : vector<4x8x8xbf16>, vector<4x8x8xbf16>, vector<4x8x8xf32> -> vector<4x8x8xf32>
    %cst_6 = arith.constant 0.353553385 : f32
    %39 = vector.broadcast %cst_6 : f32 to vector<4x8x8xf32>
    %40 = arith.mulf %38, %39 : vector<4x8x8xf32>
    %cst_7 = arith.constant dense<0xFF800000> : vector<4x8xf32>
    %41 = vector.multi_reduction <maximumf>, %40, %cst_7 [2] : vector<4x8x8xf32> to vector<4x8xf32>
    %42 = vector.shape_cast %41 : vector<4x8xf32> to vector<4x8x1xf32>
    %43 = vector.broadcast %42 : vector<4x8x1xf32> to vector<4x8x8xf32>
    %44 = arith.subf %40, %43 : vector<4x8x8xf32>
    %45 = math.exp %44 : vector<4x8x8xf32>
    %cst_8 = arith.constant dense<0.000000e+00> : vector<4x8xf32>
    %46 = vector.multi_reduction <add>, %45, %cst_8 [2] : vector<4x8x8xf32> to vector<4x8xf32>
    %47 = vector.shape_cast %46 : vector<4x8xf32> to vector<4x8x1xf32>
    %48 = vector.broadcast %47 : vector<4x8x1xf32> to vector<4x8x8xf32>
    %49 = arith.divf %45, %48 : vector<4x8x8xf32>
    %50 = arith.truncf %49 : vector<4x8x8xf32> to vector<4x8x8xbf16>
    %cst_9 = arith.constant dense<0.000000e+00> : vector<4x8x8xf32>
    %51 = tpu.matmul %50, %37, %cst_9 {dimension_numbers = #tpu.dot_dimension_numbers<[2], [1], [1], [2], [0, 0, 0, 1, 1, 2], [0], [0]>} : vector<4x8x8xbf16>, vector<4x8x8xbf16>, vector<4x8x8xf32> -> vector<4x8x8xf32>
    %52 = arith.truncf %51 : vector<4x8x8xf32> to vector<4x8x8xbf16>
    %c0_10 = arith.constant 0 : index
    %c0_11 = arith.constant 0 : index
    %c0_12 = arith.constant 0 : index
    %c0_13 = arith.constant 0 : index
    %53 = vector.load %arg5[%c0_10, %c0_11, %c0_12, %c0_13] : memref<1x4x8x32xbf16, #tpu.memory_space<vmem>>, vector<1x4x8x32xbf16>
    %54 = vector.shape_cast %53 : vector<1x4x8x32xbf16> to vector<4x8x32xbf16>
    %cst_14 = arith.constant dense<0.000000e+00> : vector<4x8x32xf32>
    %55 = tpu.matmul %52, %54, %cst_14 {dimension_numbers = #tpu.dot_dimension_numbers<[2], [1], [1], [2], [0, 0, 0, 1, 1, 2], [0], [0]>} : vector<4x8x8xbf16>, vector<4x8x32xbf16>, vector<4x8x32xf32> -> vector<4x8x32xf32>
    %cst_15 = arith.constant dense<0.000000e+00> : vector<8x32xf32>
    %56 = vector.multi_reduction <add>, %55, %cst_15 [0] : vector<4x8x32xf32> to vector<8x32xf32>
    %57 = arith.addf %3, %56 : vector<8x32xf32>
    %c0_16 = arith.constant 0 : index
    %c0_17 = arith.constant 0 : index
    %c0_18 = arith.constant 0 : index
    %58 = vector.load %arg6[%c0_16, %c0_17, %c0_18] : memref<1x1x32xf32, #tpu.memory_space<vmem>>, vector<1x1x32xf32>
    %59 = vector.shape_cast %58 : vector<1x1x32xf32> to vector<1x32xf32>
    %c0_19 = arith.constant 0 : index
    %c0_20 = arith.constant 0 : index
    %c0_21 = arith.constant 0 : index
    %60 = vector.load %arg7[%c0_19, %c0_20, %c0_21] : memref<1x1x32xf32, #tpu.memory_space<vmem>>, vector<1x1x32xf32>
    %61 = vector.shape_cast %60 : vector<1x1x32xf32> to vector<1x32xf32>
    %cst_22 = arith.constant dense<0.000000e+00> : vector<8xf32>
    %62 = vector.multi_reduction <add>, %57, %cst_22 [1] : vector<8x32xf32> to vector<8xf32>
    %63 = vector.shape_cast %62 : vector<8xf32> to vector<8x1xf32>
    %cst_23 = arith.constant 3.200000e+01 : f32
    %64 = vector.broadcast %cst_23 : f32 to vector<8x1xf32>
    %65 = arith.divf %63, %64 : vector<8x1xf32>
    %66 = vector.broadcast %65 : vector<8x1xf32> to vector<8x32xf32>
    %67 = arith.subf %57, %66 : vector<8x32xf32>
    %68 = arith.mulf %67, %67 : vector<8x32xf32>
    %cst_24 = arith.constant dense<0.000000e+00> : vector<8xf32>
    %69 = vector.multi_reduction <add>, %68, %cst_24 [1] : vector<8x32xf32> to vector<8xf32>
    %70 = vector.shape_cast %69 : vector<8xf32> to vector<8x1xf32>
    %cst_25 = arith.constant 3.200000e+01 : f32
    %71 = vector.broadcast %cst_25 : f32 to vector<8x1xf32>
    %72 = arith.divf %70, %71 : vector<8x1xf32>
    %73 = vector.broadcast %65 : vector<8x1xf32> to vector<8x32xf32>
    %74 = arith.subf %57, %73 : vector<8x32xf32>
    %cst_26 = arith.constant 9.99999974E-6 : f32
    %75 = vector.broadcast %cst_26 : f32 to vector<8x1xf32>
    %76 = arith.addf %72, %75 : vector<8x1xf32>
    %77 = math.rsqrt %76 : vector<8x1xf32>
    %78 = vector.broadcast %77 : vector<8x1xf32> to vector<8x32xf32>
    %79 = arith.mulf %74, %78 : vector<8x32xf32>
    %80 = vector.broadcast %59 : vector<1x32xf32> to vector<8x32xf32>
    %81 = arith.mulf %79, %80 : vector<8x32xf32>
    %82 = vector.broadcast %61 : vector<1x32xf32> to vector<8x32xf32>
    %83 = arith.addf %81, %82 : vector<8x32xf32>
    %84 = arith.truncf %83 : vector<8x32xf32> to vector<8x32xbf16>
    %c0_27 = arith.constant 0 : index
    %c0_28 = arith.constant 0 : index
    %c0_29 = arith.constant 0 : index
    %85 = vector.load %arg8[%c0_27, %c0_28, %c0_29] : memref<1x32x64xbf16, #tpu.memory_space<vmem>>, vector<1x32x64xbf16>
    %86 = vector.shape_cast %85 : vector<1x32x64xbf16> to vector<32x64xbf16>
    %cst_30 = arith.constant dense<0.000000e+00> : vector<8x64xf32>
    %87 = tpu.matmul %84, %86, %cst_30 {dimension_numbers = #tpu.dot_dimension_numbers<[1], [0], [0], [1], [0, 0, 1, 1], [], []>} : vector<8x32xbf16>, vector<32x64xbf16>, vector<8x64xf32> -> vector<8x64xf32>
    %c0_31 = arith.constant 0 : index
    %c0_32 = arith.constant 0 : index
    %c0_33 = arith.constant 0 : index
    %88 = vector.load %arg9[%c0_31, %c0_32, %c0_33] : memref<1x1x64xf32, #tpu.memory_space<vmem>>, vector<1x1x64xf32>
    %89 = vector.shape_cast %88 : vector<1x1x64xf32> to vector<1x64xf32>
    %90 = vector.broadcast %89 : vector<1x64xf32> to vector<8x64xf32>
    %91 = arith.addf %87, %90 : vector<8x64xf32>
    %cst_34 = arith.constant 0.000000e+00 : f32
    %92 = vector.broadcast %cst_34 : f32 to vector<8x64xf32>
    %93 = arith.maximumf %91, %92 : vector<8x64xf32>
    %94 = arith.truncf %93 : vector<8x64xf32> to vector<8x64xbf16>
    %c0_35 = arith.constant 0 : index
    %c0_36 = arith.constant 0 : index
    %c0_37 = arith.constant 0 : index
    %95 = vector.load %arg10[%c0_35, %c0_36, %c0_37] : memref<1x64x32xbf16, #tpu.memory_space<vmem>>, vector<1x64x32xbf16>
    %96 = vector.shape_cast %95 : vector<1x64x32xbf16> to vector<64x32xbf16>
    %cst_38 = arith.constant dense<0.000000e+00> : vector<8x32xf32>
    %97 = tpu.matmul %94, %96, %cst_38 {dimension_numbers = #tpu.dot_dimension_numbers<[1], [0], [0], [1], [0, 0, 1, 1], [], []>} : vector<8x64xbf16>, vector<64x32xbf16>, vector<8x32xf32> -> vector<8x32xf32>
    %c0_39 = arith.constant 0 : index
    %c0_40 = arith.constant 0 : index
    %c0_41 = arith.constant 0 : index
    %98 = vector.load %arg11[%c0_39, %c0_40, %c0_41] : memref<1x1x32xf32, #tpu.memory_space<vmem>>, vector<1x1x32xf32>
    %99 = vector.shape_cast %98 : vector<1x1x32xf32> to vector<1x32xf32>
    %100 = vector.broadcast %99 : vector<1x32xf32> to vector<8x32xf32>
    %101 = arith.addf %97, %100 : vector<8x32xf32>
    %102 = arith.addf %83, %101 : vector<8x32xf32>
    %c0_42 = arith.constant 0 : index
    %c0_43 = arith.constant 0 : index
    %c0_44 = arith.constant 0 : index
    %103 = vector.load %arg12[%c0_42, %c0_43, %c0_44] : memref<1x1x32xf32, #tpu.memory_space<vmem>>, vector<1x1x32xf32>
    %104 = vector.shape_cast %103 : vector<1x1x32xf32> to vector<1x32xf32>
    %c0_45 = arith.constant 0 : index
    %c0_46 = arith.constant 0 : index
    %c0_47 = arith.constant 0 : index
    %105 = vector.load %arg13[%c0_45, %c0_46, %c0_47] : memref<1x1x32xf32, #tpu.memory_space<vmem>>, vector<1x1x32xf32>
    %106 = vector.shape_cast %105 : vector<1x1x32xf32> to vector<1x32xf32>
    %cst_48 = arith.constant dense<0.000000e+00> : vector<8xf32>
    %107 = vector.multi_reduction <add>, %102, %cst_48 [1] : vector<8x32xf32> to vector<8xf32>
    %108 = vector.shape_cast %107 : vector<8xf32> to vector<8x1xf32>
    %cst_49 = arith.constant 3.200000e+01 : f32
    %109 = vector.broadcast %cst_49 : f32 to vector<8x1xf32>
    %110 = arith.divf %108, %109 : vector<8x1xf32>
    %111 = vector.broadcast %110 : vector<8x1xf32> to vector<8x32xf32>
    %112 = arith.subf %102, %111 : vector<8x32xf32>
    %113 = arith.mulf %112, %112 : vector<8x32xf32>
    %cst_50 = arith.constant dense<0.000000e+00> : vector<8xf32>
    %114 = vector.multi_reduction <add>, %113, %cst_50 [1] : vector<8x32xf32> to vector<8xf32>
    %115 = vector.shape_cast %114 : vector<8xf32> to vector<8x1xf32>
    %cst_51 = arith.constant 3.200000e+01 : f32
    %116 = vector.broadcast %cst_51 : f32 to vector<8x1xf32>
    %117 = arith.divf %115, %116 : vector<8x1xf32>
    %118 = vector.broadcast %110 : vector<8x1xf32> to vector<8x32xf32>
    %119 = arith.subf %102, %118 : vector<8x32xf32>
    %cst_52 = arith.constant 9.99999974E-6 : f32
    %120 = vector.broadcast %cst_52 : f32 to vector<8x1xf32>
    %121 = arith.addf %117, %120 : vector<8x1xf32>
    %122 = math.rsqrt %121 : vector<8x1xf32>
    %123 = vector.broadcast %122 : vector<8x1xf32> to vector<8x32xf32>
    %124 = arith.mulf %119, %123 : vector<8x32xf32>
    %125 = vector.broadcast %104 : vector<1x32xf32> to vector<8x32xf32>
    %126 = arith.mulf %124, %125 : vector<8x32xf32>
    %127 = vector.broadcast %106 : vector<1x32xf32> to vector<8x32xf32>
    %128 = arith.addf %126, %127 : vector<8x32xf32>
    %c0_53 = arith.constant 0 : index
    %c0_54 = arith.constant 0 : index
    %129 = vector.load %arg15[%c0_53, %c0_54] : memref<8x32xf32, #tpu.memory_space<vmem>>, vector<8x32xf32>
    tpu.vector_store %arg15[%c0_53, %c0_54], %128 {strides = array<i32>} : memref<8x32xf32, #tpu.memory_space<vmem>>, vector<8x32xf32>,
    %c1_i32 = arith.constant 1 : i32
    %130 = arith.cmpi eq, %arg1, %c1_i32 : i32
    %131 = arith.extui %130 : i1 to i32
    %c0_i32_55 = arith.constant 0 : i32
    %132 = arith.cmpi ne, %131, %c0_i32_55 : i32
    scf.if %132 {
      %c0_56 = arith.constant 0 : index
      %c0_57 = arith.constant 0 : index
      %c0_58 = arith.constant 0 : index
      %133 = vector.load %arg14[%c0_56, %c0_57, %c0_58] : memref<1x8x32xf32, #tpu.memory_space<vmem>>, vector<1x8x32xf32>
      %134 = vector.shape_cast %133 : vector<1x8x32xf32> to vector<8x32xf32>
      %135 = vector.shape_cast %128 : vector<8x32xf32> to vector<1x8x32xf32>
      tpu.vector_store %arg14[%c0_56, %c0_57, %c0_58], %135 {strides = array<i32>} : memref<1x8x32xf32, #tpu.memory_space<vmem>>, vector<1x8x32xf32>,
    } else {
    }
    return
  }
  func.func @transform_0(%arg0: i32, %arg1: i32) -> (i32, i32, i32) {
    %c0_i32 = arith.constant 0 : i32
    %c0_i32_0 = arith.constant 0 : i32
    %c0_i32_1 = arith.constant 0 : i32
    return %arg0, %c0_i32, %c0_i32_0 : i32, i32, i32
  }
  func.func @transform_1(%arg0: i32, %arg1: i32) -> (i32, i32) {
    %c0_i32 = arith.constant 0 : i32
    %c0_i32_0 = arith.constant 0 : i32
    %c0_i32_1 = arith.constant 0 : i32
    return %c0_i32, %c0_i32_0 : i32, i32
  }
  func.func @transform_2(%arg0: i32, %arg1: i32) -> (i32, i32, i32) {
    %c0_i32 = arith.constant 0 : i32
    %c0_i32_0 = arith.constant 0 : i32
    %c0_i32_1 = arith.constant 0 : i32
    return %arg1, %c0_i32, %c0_i32_0 : i32, i32, i32
  }
  func.func @transform_3(%arg0: i32, %arg1: i32) -> (i32, i32, i32, i32) {
    %c0_i32 = arith.constant 0 : i32
    %c0_i32_0 = arith.constant 0 : i32
    %c0_i32_1 = arith.constant 0 : i32
    %c0_i32_2 = arith.constant 0 : i32
    return %arg1, %c0_i32, %c0_i32_0, %c0_i32_1 : i32, i32, i32, i32
  }
  func.func @transform_4(%arg0: i32, %arg1: i32) -> (i32, i32, i32) {
    %c0_i32 = arith.constant 0 : i32
    %c0_i32_0 = arith.constant 0 : i32
    %c0_i32_1 = arith.constant 0 : i32
    return %arg1, %c0_i32, %c0_i32_0 : i32, i32, i32
  }
  func.func @transform_5(%arg0: i32, %arg1: i32) -> (i32, i32, i32) {
    %c0_i32 = arith.constant 0 : i32
    %c0_i32_0 = arith.constant 0 : i32
    %c0_i32_1 = arith.constant 0 : i32
    return %arg1, %c0_i32, %c0_i32_0 : i32, i32, i32
  }
  func.func @transform_6(%arg0: i32, %arg1: i32) -> (i32, i32, i32) {
    %c0_i32 = arith.constant 0 : i32
    %c0_i32_0 = arith.constant 0 : i32
    %c0_i32_1 = arith.constant 0 : i32
    return %arg1, %c0_i32, %c0_i32_0 : i32, i32, i32
  }
  func.func @transform_7(%arg0: i32, %arg1: i32) -> (i32, i32, i32) {
    %c0_i32 = arith.constant 0 : i32
    %c0_i32_0 = arith.constant 0 : i32
    %c0_i32_1 = arith.constant 0 : i32
    return %arg1, %c0_i32, %c0_i32_0 : i32, i32, i32
  }
  func.func @transform_8(%arg0: i32, %arg1: i32) -> (i32, i32, i32) {
    %c0_i32 = arith.constant 0 : i32
    %c0_i32_0 = arith.constant 0 : i32
    %c0_i32_1 = arith.constant 0 : i32
    return %arg1, %c0_i32, %c0_i32_0 : i32, i32, i32
  }
  func.func @transform_9(%arg0: i32, %arg1: i32) -> (i32, i32, i32) {
    %c0_i32 = arith.constant 0 : i32
    %c0_i32_0 = arith.constant 0 : i32
    %c0_i32_1 = arith.constant 0 : i32
    return %arg1, %c0_i32, %c0_i32_0 : i32, i32, i32
  }
  func.func @transform_10(%arg0: i32, %arg1: i32) -> (i32, i32, i32) {
    %c0_i32 = arith.constant 0 : i32
    %c0_i32_0 = arith.constant 0 : i32
    %c0_i32_1 = arith.constant 0 : i32
    return %arg1, %c0_i32, %c0_i32_0 : i32, i32, i32
  }
  func.func @transform_11(%arg0: i32, %arg1: i32) -> (i32, i32, i32) {
    %c0_i32 = arith.constant 0 : i32
    %c0_i32_0 = arith.constant 0 : i32
    %c0_i32_1 = arith.constant 0 : i32
    return %arg1, %c0_i32, %c0_i32_0 : i32, i32, i32
  }
  func.func @transform_12(%arg0: i32, %arg1: i32) -> (i32, i32, i32) {
    %c0_i32 = arith.constant 0 : i32
    %c0_i32_0 = arith.constant 0 : i32
    %c0_i32_1 = arith.constant 0 : i32
    return %arg0, %c0_i32, %c0_i32_0 : i32, i32, i32
  }
}

</mosaic_0001>

<bundles_post_ra>
// kernel: tpu_custom_call.1
= control target key start
LH: loop header
LB: loop body
LE: loop exit
PB: predicated region body
PF: predicated region fallthrough
CT: control target
= control target key end

     0   :  { %s2760_s0 = inlined_call_operand.hbm [shape: f32[2,8,32], index: 0, kind: input, shape index: {}]   ;;  %s2761_s1 = inlined_call_operand.hbm [shape: f32[8,32], index: 1, kind: input, shape index: {}]   ;;  %s2762_s2 = inlined_call_operand.vmem [shape: bf16[2,32,96], index: 2, kind: input, shape index: {}]   ;;  %s2763_s3 = inlined_call_operand.vmem [shape: bf16[2,4,8,32], index: 3, kind: input, shape index: {}]   ;;  %s2764_s4 = inlined_call_operand.vmem [shape: f32[2,1,32], index: 4, kind: input, shape index: {}]   ;;  %s2765_s5 = inlined_call_operand.vmem [shape: f32[2,1,32], index: 5, kind: input, shape index: {}]   ;;  %s2766_s6 = inlined_call_operand.vmem [shape: bf16[2,32,64], index: 6, kind: input, shape index: {}]   ;;  %s2767_s7 = inlined_call_operand.vmem [shape: f32[2,1,64], index: 7, kind: input, shape index: {}]   ;;  %s2768_s8 = inlined_call_operand.vmem [shape: bf16[2,64,32], index: 8, kind: input, shape index: {}]   ;;  %s2769_s9 = inlined_call_operand.vmem [shape: f32[2,1,32], index: 9, kind: input, shape index: {}]   ;;  %s2770_s10 = inlined_call_operand.vmem [shape: f32[2,1,32], index: 10, kind: input, shape index: {}]   ;;  %s2771_s11 = inlined_call_operand.vmem [shape: f32[2,1,32], index: 11, kind: input, shape index: {}]   ;;  %s2772_s12 = inlined_call_operand.hbm [shape: f32[2,8,32], index: 12, kind: output, shape index: {}]  }
   0x1   :  { %2789 = sst [smem:[#allocation24_spill]] %s2760_s0 }
   0x2   :  { %2790 = sst [smem:[#allocation25_spill]] %s2761_s1 }
   0x3   :  { %2791 = sst [smem:[#allocation26_spill]] %s2762_s2 }
   0x4   :  { %2792 = sst [smem:[#allocation27_spill]] %s2763_s3 }
   0x5   :  { %2793 = sst [smem:[#allocation28_spill]] %s2766_s6 }
   0x6   :  { %2794 = sst [smem:[#allocation29_spill]] %s2770_s10 }
   0x7   :  { %2795 = sst [smem:[#allocation30_spill]] %s2771_s11 }
   0x8   :  { %2796 = sst [smem:[#allocation31_spill]] %s2772_s12 }
   0x9   :  { %17 = vsyncpa [#allocation4], 0 }
   0xa   :  { %19 = vsyncpa [#allocation4 + $0x1], 0 }
   0xb   :  { %20 = vsyncpa [#allocation7], 0 }
   0xc   :  { %21 = vsyncpa [#allocation5], 0 }
   0xd   :  { %23 = vsyncpa [#allocation5 + $0x1], 0  ;;  %s2326_s21 = smov 0   ;;  %s2328_s22 = smov 0  }
   0xe   :  { %s2330_s23 = smov 0   ;;  %s2332_s24 = smov 0  }
   0xf   :  { %s2334_s25 = smov 0   ;;  %s2336_s26 = smov 0  }
  0x10   :  { %s2338_s27 = smov 0   ;;  %s2340_s28 = smov 0  }
  0x11 LB: > { %2797 = sst [smem:[#allocation12_spill]] %s2221_s21  ;;  %s1772_s29 = sadd.s32 4294967295, %s2249_s28   ;;  %s2249_s28 = sphi %s2340_s28, %s29_s28   ;;  %s2245_s27 = sphi %s2338_s27, %s2845_s27   ;;  %s2241_s26 = sphi %s2336_s26, %s2844_s26   ;;  %s2237_s25 = sphi %s2334_s25, %s2843_s25   ;;  %s2233_s24 = sphi %s2332_s24, %s2842_s24   ;;  %s2229_s23 = sphi %s2330_s23, %s2841_s23   ;;  %s2225_s22 = sphi %s2328_s22, %s2840_s22   ;;  %s2221_s21 = sphi %s2326_s21, %s2839_s21  }
  0x12   : > { %2798 = sst [smem:[#allocation13_spill]] %s2225_s22  ;;  %s1773_s30 = sadd.s32 4294967294, %s2249_s28  }
  0x13   : > { %2799 = sst [smem:[#allocation14_spill]] %s2229_s23  ;;  %p61_p0 = scmp.ne.s32.totalorder %s2225_s22, %s2221_s21 }
  0x14   : > { %2800 = sst [smem:[#allocation15_spill]] %s2237_s25  ;;  %p2370_p1 = scmp.eq.s32.totalorder %s1772_s29, 0 }
  0x15   : > { %2801 = sst [smem:[#allocation16_spill]] %s2241_s26  ;;  %p2374_p2 = scmp.eq.s32.totalorder %s1772_s29, 3 }
  0x16   : > { %2802 = sst [smem:[#allocation17_spill]] %s2245_s27  ;;  %p372_p3 = scmp.eq.s32.totalorder %s1773_s30, 3 }
  0x17   : > { %2803 = sst [smem:[#allocation18_spill]] %s2249_s28  ;;  %p2380_p4 = por %p2370_p1, %p61_p0 }
  0x18   : > { %s2804_s13 = scalar_select %p2370_p1, 1, 0 }
  0x19   : > { %s2805_s14 = scalar_select %p2374_p2, 1, 0 }
  0x1a   : > { %s2806_s15 = scalar_select %p2380_p4, 1, 0 }
  0x1b   : > { %p1774_p5 = scmp.ge.s32.totalorder %s2249_s28, 1  ;;  %p2385_p6 = por %p372_p3, %p61_p0 }
  0x1c   : > { %p379_p7 = scmp.lt.s32.totalorder %s2249_s28, 5  ;;  %s2251_s18 = smov [#allocation6]  }
  0x1d   : > { %s2807_s16 = scalar_select %p2385_p6, 1, 0 }
  0x1e   : > { %p2390_p8 = pnand %p1774_p5, %p379_p7  ;;  %s392_s19 = sshll.u32 %s2251_s18, 4  ;;  %s393_s19 = int_to_ptr.vmem [resolvable:$true] %s392_s19 }
  0x1f   : > { %2808 = sst [smem:[#allocation19_spill]] %s2807_s16  ;;  %s38_s29 = sadd.s32 1, %s2241_s26 }
  0x20   : > { %s2809_s17 = scalar_select %p2390_p8, 1, 0 }
  0x21   : > { %p1973_p9 = pneg %p2390_p8  ;;  %s2811_s1 = sld [smem:[#allocation25_spill]] }
  0x23   : > { %p2398_p10 = pnand %p1973_p9, %p2370_p1 }
  0x25   : > { %p2091_p12 = pneg %p2398_p10 }
  0x27   : > { %s2089_s21 = scalar_lea.hbm %s2811_s1, 128 }
  0x28   : > { %p2090_p11 = scmp.ne.s32.totalorder %s2811_s1, %s2089_s21  ;;  %p2096_p3 = scmp.lt.u32.totalorder %s2089_s21, %s2811_s1 }
  0x2a   : > { %p2092_p13 = pnand %p2091_p12, %p2090_p11 }
  0x2c   : > { %p2093_p0 = pneg %p2092_p13 }
  0x2e   : > { %p2098_p5 = pnand %p2096_p3, %p2093_p0 }
  0x30   : > { %2101 = shalt.err (!%p2098_p5)
}
  0x31   : > { %s2102_s10 = scalar_lea.vmem %s393_s19, 128  ;;  %p2110_p1 = scmp.lt.s32.totalorder %s393_s19, %s393_s19 }
  0x32   : > { %p2103_p7 = scmp.ne.s32.totalorder %s393_s19, %s2102_s10  ;;  %p2111_p4 = scmp.lt.s32.totalorder %s2102_s10, %s2102_s10 }
  0x34   : > { %p2105_p9 = pnand %p2103_p7, %p2091_p12  ;;  %p2112_p8 = por %p2111_p4, %p2110_p1 }
  0x36   : > { %p2106_p6 = pneg %p2105_p9 }
  0x38   : > { %p2113_p2 = pnand %p2112_p8, %p2106_p6 }
  0x3a   : > { %2116 = shalt.err (!%p2113_p2)
}
  0x3b   : > { %1976 = dma.hbm_to_vmem [thread:$0]  (!%p2398_p10), %s2811_s1, 128, %s393_s19, [#allocation7]  }
  0x3c   : > { %p39_p11 = scmp.ge.s32.totalorder %s38_s29, 2  ;;  %s41_s10 = sadd.s32 1, %s2245_s27 }
  0x3d   : > { %s48_s11 = sadd.s32 1, %s2229_s23  ;;  %p55_p1 = scmp.ne.s32.totalorder %s2229_s23, %s2225_s22 }
  0x3e   : > { %s2847_s29 = smov (%p39_p11, %s38_s29), 0  ;;  %s2849_s10 = smov (!%p39_p11, %s41_s10), %s2245_s27 }
  0x3f   : > { %2812 = sst [smem:[#allocation20_spill]] %s2847_s29  ;;  %p56_p2 = scmp.eq.s32.totalorder %s2249_s28, 0 }
  0x40   : > { %p2813_p4 = scmp.ne.s32.totalorder %s2805_s14, 0  ;;  %p43_p8 = scmp.ge.s32.totalorder %s2849_s10, 2 }
  0x41   : > { %p1986_p12 = scmp.lt.s32.totalorder %s2249_s28, 4  ;;  %p57_p13 = por %p56_p2, %p55_p1 }
  0x42   : > { %p2429_p6 = por %p2813_p4, %p55_p1  ;;  %s403_s16 = sand.u32 1, %s2229_s23  }
  0x43   : > { %s2851_s10 = smov (%p43_p8, %s2849_s10), 0  ;;  %s1777_s19 = sshll.u32 %s403_s16, 3 }
  0x44   : > { %s2814_s21 = scalar_select %p2429_p6, 1, 0 }
  0x45   : > { %2816 = sst [smem:[#allocation22_spill]] %s2851_s10  ;;  %s45_s20 = ssub.s32 %s2245_s27, %s2851_s10 }
  0x46   : > { %2815 = sst [smem:[#allocation21_spill]] %s2814_s21  ;;  %p46_p10 = scmp.eq.s32.totalorder %s45_s20, 0 }
  0x47   : > { %s1778_s30 = sshll.u32 %s2245_s27, 7  ;;  %s2817_s0 = sld [smem:[#allocation24_spill]] }
  0x48   : > { %s407_s25 = scalar_lea.vmem [#allocation3], %s1777_s19  ;;  %p2452_p0 = pnand %p1986_p12, %p57_p13 }
  0x49   : > { %s414_s1 = sshll.u32 %s407_s25, 4  ;;  %s404_s20 = scalar_lea.sflag [#allocation4], %s403_s16  ;;  %s2448_s1 = int_to_ptr.vmem [resolvable:$true] %s414_s1 }
  0x4a   : > { %s2446_s29 = scalar_select %p46_p10, %s2229_s23, %s48_s11  }
  0x4b   : > { %p2119_p5 = pneg %p2452_p0 }
  0x4c   : > { %2818 = sst [smem:[#allocation23_spill]] %s2446_s29 }
  0x4d   : > { %s2443_s14 = scalar_lea.hbm %s2817_s0, %s1778_s30  ;;  %s2122_s18 = scalar_lea.hbm %s2817_s0, 256 }
  0x4e   : > { %s2117_s30 = scalar_lea.hbm %s2443_s14, 128  ;;  %p2123_p11 = scmp.lt.u32.totalorder %s2443_s14, %s2817_s0 }
  0x4f   : > { %p2118_p3 = scmp.ne.s32.totalorder %s2443_s14, %s2117_s30  ;;  %p2124_p1 = scmp.lt.u32.totalorder %s2122_s18, %s2117_s30 }
  0x50   : > { %p2126_p4 = scmp.lt.u32.totalorder %s2117_s30, %s2443_s14 }
  0x51   : > { %p2120_p7 = pnand %p2119_p5, %p2118_p3  ;;  %p2125_p2 = por %p2124_p1, %p2123_p11 }
  0x53   : > { %p2121_p9 = pneg %p2120_p7  ;;  %p2127_p8 = por %p2126_p4, %p2125_p2 }
  0x55   : > { %p2128_p12 = pnand %p2127_p8, %p2121_p9 }
  0x57   : > { %2131 = shalt.err (!%p2128_p12)
}
  0x58   : > { %s2132_s16 = scalar_lea.vmem %s2448_s1, 128  ;;  %s2252_s11 = smov [#allocation3]  }
  0x59   : > { %p2133_p13 = scmp.ne.s32.totalorder %s2448_s1, %s2132_s16  ;;  %s2137_s19 = sshll.u32 %s2252_s11, 4  ;;  %s2138_s19 = int_to_ptr.vmem [resolvable:$false] %s2137_s19 }
  0x5a   : > { %s2139_s12 = scalar_lea.vmem %s2138_s19, 256  ;;  %p2140_p7 = scmp.lt.s32.totalorder %s2448_s1, %s2138_s19 }
  0x5b   : > { %p2135_p10 = pnand %p2133_p13, %p2119_p5  ;;  %p2141_p11 = scmp.lt.s32.totalorder %s2139_s12, %s2132_s16 }
  0x5d   : > { %p2136_p3 = pneg %p2135_p10  ;;  %p2142_p1 = por %p2141_p11, %p2140_p7 }
  0x5f   : > { %p2143_p2 = pnand %p2142_p1, %p2136_p3 }
  0x61   : > { %2146 = shalt.err (!%p2143_p2)
}
  0x62   : > { %1980 = dma.hbm_to_vmem [thread:$0]  (!%p2452_p0), %s2443_s14, 128, %s2448_s1, %s404_s20  }
  0x63   : > { %p2820_p9 = scmp.ne.s32.totalorder %s2809_s17, 0 }
  0x64   : > { %s2484_s30 = sand.u32 (!%p2820_p9), 1, %s2225_s22   ;;  %p2821_p5 = scmp.ne.s32.totalorder (!%p2820_p9), %s2806_s15, 0 }
  0x65   : > { %491 = sbr.rel (%p2820_p9) target bundleno = 2647 (0xa57), region = 68  ;;  %s1780_s18 = sshll.u32 (!%p2820_p9), %s2484_s30, 3 }
  0x66   : > { %s494_s25 = scalar_lea.sflag (!%p2820_p9), [#allocation4], %s2484_s30  ;;  %s497_s16 = scalar_lea.vmem (!%p2820_p9), [#allocation3], %s1780_s18 }
  0x6c   : > { %2208 = dma.done.wait (%p2821_p5), %s494_s25, 128  }
  0x6d   : > { %2210 = vsyncadd (%p2821_p5), %s494_s25, 4294967168  ;;  %p2822_p4 = scmp.ne.s32.totalorder %s2804_s13, 0 }
  0x6f   : > { %2212 = dma.done.wait (%p2822_p4), [#allocation7], 128  }
  0x70   : > { %2214 = vsyncadd (%p2822_p4), [#allocation7], 4294967168  ;;  %p580_p0 = scmp.lt.s32.totalorder %s2233_s24, 1  ;;  %s2823_s2 = sld [smem:[#allocation26_spill]] }
  0x71   : > { %s2824_s3 = sld [smem:[#allocation27_spill]]  ;;  %s2825_s6 = sld [smem:[#allocation28_spill]] }
  0x72   : > { %s2498_s1 = scalar_select %p580_p0, %s2233_s24, 1 }
  0x73   : > { %s2826_s28 = sld [smem:[#allocation29_spill]]  ;;  %s2544_s17 = scalar_lea.vmem [#allocation8], %s1780_s18 }
  0x74   : > { %s1826_s15 = sshll.u32 %s2498_s1, 4  ;;  %s603_s14 = scalar_lea.vmem %s2767_s7, %s2498_s1 }
  0x75   : > { %s1829_s13 = sshll.u32 %s2498_s1, 5  ;;  %s611_s0 = scalar_lea.vmem %s2769_s9, %s2498_s1 }
  0x76   : > { %s584_s11 = scalar_lea.vmem %s2823_s2, %s1826_s15  ;;  %s2530_s19 = scalar_lea.vmem %s2768_s8, %s1829_s13 }
  0x77   : > { %s2511_s25 = scalar_lea.vmem %s2824_s3, %s1826_s15  ;;  %s2520_s22 = scalar_lea.vmem %s2825_s6, %s1826_s15 }
  0x78   : > { %s2827_s6 = sld [smem:[#allocation30_spill]]  ;;  %p1791_p8 = scmp.ne.s32.totalorder %s2233_s24, 0 }
  0x79   : > { %s614_s23 = scalar_lea.vmem %s2826_s28, %s2498_s1  ;;  %v623_v0 = vld [vmem:[%s497_s16] sm:$0xff] (!%p1791_p8)  ;;  %v625_v1 = vld [vmem:[#allocation6] sm:$0xff] (!%p1791_p8)  ;;  %vm627_vm0 = vcmask (!%p1791_p8), 261120  }
  0x7a   : > { %622 = sbr.rel (%p1791_p8) target bundleno = 129 (0x81), region = 80  ;;  %v624_v2 = vmul.f32 (!%p1791_p8), 5.656854, %v623_v0 }
  0x7c   : > { %v626_v3 = vadd.f32 (!%p1791_p8), %v625_v1, %v624_v2 }
  0x7e   : > { %s617_s21 = scalar_lea.vmem %s2827_s6, %s2498_s1  ;;  %628 = vst.msk [vmem:[#allocation2] sm:$0xff] (!%p1791_p8), %vm627_vm0, %v626_v3 }
  0x81 PF: > { %v2061_v4 = vld [vmem:[%s584_s11] sm:$0xff]   ;;  %v2253_v5 = vmov 0.0   ;;  %v2062_v6 = vld [vmem:[%s584_s11 + $0x8] sm:$0xff]   ;;  %vm2254_vm1 = vmmov 0   ;;  %vm647_vm2 = vcmask 261120   ;;  %s2255_s2 = smov 104   ;;  %s2828_s16 = scalar_lea.vmem %s2764_s4, %s2498_s1 }
  0x82   : > { %1865 = vmatprep.subr.bf16.mxu1 %v2253_v5  ;;  %1879 = vmatprep.subr.bf16.mxu0 %v2253_v5  ;;  %s2256_s3 = smov 120   ;;  %s2257_s6 = smov 112   ;;  %vm708_vm3 = vcmask 64512   ;;  %vm959_vm4 = vcmask 1043456   ;;  %vm1485_vm5 = vcmask 523264  }
  0x83   : > { %1866 = vmatpush3.bf16.msra.mxu1 %v2061_v4  ;;  %1869 = vmatprep.mubr.msk.bf16.mxu1 %vm2254_vm1, %v2253_v5  ;;  %s2258_s26 = smov 96   ;;  %s2259_s28 = smov 64  }
  0x84   : > { %1867 = vmatprep.subr.bf16.mxu1 %v2253_v5  ;;  %1881 = vmatprep.mubr.msk.bf16.mxu0 %vm2254_vm1, %v2253_v5  ;;  %s2829_s10 = scalar_lea.vmem %s2765_s5, %s2498_s1  ;;  %p1821_p12 = scmp.ne.s32.totalorder %s2233_s24, 1 }
  0x85   : > { %v2551_v7 = vld [vmem:[#allocation2] sm:$0xff] }
  0x86   : > { %v630_v8 = vpack.c.bf16 %v2551_v7, %v2551_v7 }
  0x87   : > { %1868 = vmatpush3.bf16.msra.mxu1 %v2062_v6 }
  0x88   : > { %1873 = vmatprep.subr.bf16.mxu1 %v2253_v5 }
  0x8a   : > { %1870 = vmatmul.mubr.msk.bf16.vlgmr.msra.gmra.mrb[0].mxu1 %vm647_vm2, %v630_v8 }
  0x8b   : > { %1875 = vmatprep.mubr.msk.bf16.mxu1 %vm2254_vm1, %v2253_v5 }
 0x15d   : > { %v685_v9 = vpop.f32.mrb[0].mxu1 }
 0x15e   : > { %698 = vrot.lane.b32.xlu1 %v685_v9, %s2255_s2  ;;  %692 = vrot.lane.b32.xlu0 %v685_v9, %s2256_s3  ;;  %v1871_v10 = vpop.f32.mrb[1].mxu1  ;;  %v2562_v13 = vpack.c.bf16 %v685_v9, %v685_v9 }
 0x15f   : > { %v688_v11 = vpop.f32.mrb[2].mxu1 }
 0x160   : > { %v1872_v12 = vpop.f32.mrb[3].mxu1 }
 0x162   : > { %695 = vrot.lane.b32.xlu0 %v685_v9, %s2257_s6  ;;  %706 = vrot.lane.b32.xlu1 %v2562_v13, %s2258_s26 }
 0x1d0   : > { %v699_v14 = vpop.permute.xlu1 %698  ;;  %v693_v15 = vpop.permute.xlu0 %692 }
 0x1d1   : > { %v702_v16 = vpack.c.bf16 %v693_v15, %v693_v15  ;;  %v2565_v19 = vpack.c.bf16 %v699_v14, %v699_v14 }
 0x1d3   : > { %756 = vrot.lane.b32.xlu0 %v702_v16, %s2258_s26 }
 0x1d4   : > { %v696_v17 = vpop.permute.xlu0 %695  ;;  %v707_v18 = vpop.permute.xlu1 %706 }
 0x1d5   : > { %v2567_v20 = vpack.c.bf16 %v696_v17, %v696_v17  ;;  %v713_v21 = vsel %vm708_vm3, %v707_v18, 0 }
 0x1d6   : > { %1874 = vmatpush3.bf16.xpose.msra.mxu1 %v713_v21 }
 0x1d7   : > { %854 = vrot.lane.b32.xlu0 %v2565_v19, %s2258_s26  ;;  %805 = vrot.lane.b32.xlu1 %v2567_v20, %s2258_s26 }
 0x1d8   : > { %1885 = vmatprep.subr.bf16.mxu1 %v2253_v5 }
 0x1dd   : > { %1876 = vmatmul.mubr.msk.bf16.vlgmr.msra.gmra.mrb[4].mxu1 %vm708_vm3, %v2562_v13 }
 0x1de   : > { %1887 = vmatprep.mubr.msk.bf16.mxu1 %vm2254_vm1, %v2253_v5 }
 0x245   : > { %v757_v22 = vpop.permute.xlu0 %756 }
 0x246   : > { %v762_v23 = vsel %vm708_vm3, %v757_v22, 0 }
 0x247   : > { %1880 = vmatpush3.bf16.xpose.msra.mxu0 %v762_v23 }
 0x248   : > { %1891 = vmatprep.subr.bf16.mxu0 %v2253_v5 }
 0x249   : > { %v806_v24 = vpop.permute.xlu1 %805  ;;  %v855_v26 = vpop.permute.xlu0 %854 }
 0x24a   : > { %v811_v25 = vsel %vm708_vm3, %v806_v24, 0  ;;  %v860_v27 = vsel %vm708_vm3, %v855_v26, 0 }
 0x24b   : > { %1886 = vmatpush3.bf16.xpose.msra.mxu1 %v811_v25 }
 0x24c   : > { %1897 = vmatprep.subr.bf16.mxu1 %v2253_v5 }
 0x24e   : > { %1882 = vmatmul.mubr.msk.bf16.vlgmr.msra.gmra.mrb[0].mxu0 %vm708_vm3, %v702_v16 }
 0x24f   : > { %1892 = vmatpush3.bf16.xpose.msra.mxu0 %v860_v27  ;;  %1893 = vmatprep.mubr.msk.bf16.mxu0 %vm2254_vm1, %v2253_v5 }
 0x250   : > { %1903 = vmatprep.subr.bf16.mxu0 %v2253_v5 }
 0x252   : > { %1888 = vmatmul.mubr.msk.bf16.vlgmr.msra.gmra.mrb[8].mxu1 %vm708_vm3, %v2567_v20 }
 0x253   : > { %1899 = vmatprep.mubr.msk.bf16.mxu1 %vm2254_vm1, %v2253_v5 }
 0x256   : > { %1894 = vmatmul.mubr.msk.bf16.vlgmr.msra.gmra.mrb[4].mxu0 %vm708_vm3, %v2565_v19 }
 0x257   : > { %1905 = vmatprep.mubr.msk.bf16.mxu0 %vm2254_vm1, %v2253_v5 }
 0x2b0   : > { %v749_v28 = vpop.f32.mrb[4].mxu1 }
 0x2b1   : > { %v902_v29 = vmul.f32 0.35355338, %v749_v28  ;;  %v1877_v30 = vpop.f32.mrb[5].mxu1  ;;  %v1151_v28 = vld [vmem:[%s2511_s25] sm:$0xf] }
 0x2b2   : > { %v752_v31 = vpop.f32.mrb[6].mxu1 }
 0x2b3   : > { %v1878_v32 = vpop.f32.mrb[7].mxu1  ;;  %v906_v33 = vsel %vm708_vm3, %v902_v29, -inf }
 0x2b4   : > { %907 = vmax.xlane.f32.xlu1 %v906_v33  ;;  %v1159_v32 = vsel %vm959_vm4, %v1151_v28, 0 }
 0x321   : > { %v798_v34 = vpop.f32.mrb[0].mxu0 }
 0x322   : > { %v903_v35 = vmul.f32 0.35355338, %v798_v34  ;;  %v1883_v36 = vpop.f32.mrb[1].mxu0  ;;  %v1152_v34 = vld [vmem:[%s2511_s25 + $0x4] sm:$0xf] }
 0x323   : > { %v801_v37 = vpop.f32.mrb[2].mxu0 }
 0x324   : > { %v1884_v38 = vpop.f32.mrb[3].mxu0  ;;  %v909_v39 = vsel %vm708_vm3, %v903_v35, -inf  ;;  %v1205_v37 = vsel %vm959_vm4, %v1152_v34, 0 }
 0x325   : > { %910 = vmax.xlane.f32.xlu0 %v909_v39  ;;  %v847_v40 = vpop.f32.mrb[8].mxu1  ;;  %v1153_v38 = vld [vmem:[%s2511_s25 + $0x8] sm:$0xf] }
 0x326   : > { %v904_v41 = vmul.f32 0.35355338, %v847_v40  ;;  %v1889_v42 = vpop.f32.mrb[9].mxu1 }
 0x327   : > { %v850_v43 = vpop.f32.mrb[10].mxu1  ;;  %v1251_v42 = vsel %vm959_vm4, %v1153_v38, 0 }
 0x328   : > { %v1890_v44 = vpop.f32.mrb[11].mxu1  ;;  %v912_v45 = vsel %vm708_vm3, %v904_v41, -inf }
 0x329   : > { %v896_v46 = vpop.f32.mrb[4].mxu0  ;;  %913 = vmax.xlane.f32.xlu0 %v912_v45  ;;  %v1154_v45 = vld [vmem:[%s2511_s25 + $0xc] sm:$0xf] }
 0x32a   : > { %v905_v47 = vmul.f32 0.35355338, %v896_v46  ;;  %v1895_v48 = vpop.f32.mrb[5].mxu0 }
 0x32b   : > { %v899_v49 = vpop.f32.mrb[6].mxu0 }
 0x32c   : > { %v1896_v50 = vpop.f32.mrb[7].mxu0  ;;  %v915_v51 = vsel %vm708_vm3, %v905_v47, -inf  ;;  %v1297_v49 = vsel %vm959_vm4, %v1154_v45, 0  ;;  %v1809_v45 = vld [vmem:[%s603_s14] ss:$0 sm:$0xff] }
 0x32d   : > { %916 = vmax.xlane.f32.xlu1 %v915_v51 }
 0x33e   : > { %1003 = vrot.lane.b32.xlu1 %v702_v16, %s2259_s28 }
 0x33f   : > { %954 = vrot.lane.b32.xlu0 %v2562_v13, %s2259_s28 }
 0x341   : > { %v908_v52 = vpop.xlane.xlu1 %907 }
 0x342   : > { %v918_v53 = vsub.f32 %v902_v29, %v908_v52 }
 0x344   : > { %v922_v54 = vmul.f32 1.442695, %v918_v53 }
 0x346   : > { %2069 = vpow2.f32 %v922_v54 }
 0x350   : > { %v2070_v55 = vpop.eup %2069 }
 0x351   : > { %v930_v56 = vsel %vm708_vm3, %v2070_v55, 0.0 }
 0x35e   : > { %931 = vadd.xlane.f32.xlu0 %v930_v56 }
 0x3b2   : > { %v911_v57 = vpop.xlane.xlu0 %910 }
 0x3b3   : > { %v919_v58 = vsub.f32 %v903_v35, %v911_v57 }
 0x3b5   : > { %v924_v59 = vmul.f32 1.442695, %v919_v58 }
 0x3b6   : > { %v914_v60 = vpop.xlane.xlu0 %913 }
 0x3b7   : > { %2071 = vpow2.f32 %v924_v59  ;;  %v920_v61 = vsub.f32 %v904_v41, %v914_v60 }
 0x3b9   : > { %v926_v62 = vmul.f32 1.442695, %v920_v61 }
 0x3ba   : > { %v917_v63 = vpop.xlane.xlu1 %916  ;;  %v955_v0 = vpop.permute.xlu0 %954 }
 0x3bb   : > { %2073 = vpow2.f32 %v926_v62  ;;  %v921_v1 = vsub.f32 %v905_v47, %v917_v63  ;;  %v961_v2 = vsel %vm959_vm4, %v955_v0, 0 }
 0x3bc   : > { %1898 = vmatpush3.bf16.msra.mxu1 %v961_v2 }
 0x3bd   : > { %v928_v3 = vmul.f32 1.442695, %v921_v1  ;;  %1909 = vmatprep.subr.bf16.mxu1 %v2253_v5 }
 0x3be   : > { %v1004_v4 = vpop.permute.xlu1 %1003 }
 0x3bf   : > { %2075 = vpow2.f32 %v928_v3  ;;  %v1009_v6 = vsel %vm959_vm4, %v1004_v4, 0 }
 0x3c0   : > { %1904 = vmatpush3.bf16.msra.mxu0 %v1009_v6 }
 0x3c1   : > { %v2072_v8 = vpop.eup %2071  ;;  %1915 = vmatprep.subr.bf16.mxu0 %v2253_v5 }
 0x3c2   : > { %v933_v9 = vsel %vm708_vm3, %v2072_v8, 0.0 }
 0x3c3   : > { %934 = vadd.xlane.f32.xlu1 %v933_v9 }
 0x3c5   : > { %v2074_v10 = vpop.eup %2073 }
 0x3c6   : > { %v936_v11 = vsel %vm708_vm3, %v2074_v10, 0.0 }
 0x3c7   : > { %937 = vadd.xlane.f32.xlu0 %v936_v11 }
 0x3c9   : > { %v2076_v12 = vpop.eup %2075 }
 0x3ca   : > { %v939_v13 = vsel %vm708_vm3, %v2076_v12, 0.0 }
 0x3cb   : > { %940 = vadd.xlane.f32.xlu1 %v939_v13 }
 0x3dc   : > { %1051 = vrot.lane.b32.xlu1 %v2567_v20, %s2259_s28 }
 0x3dd   : > { %1099 = vrot.lane.b32.xlu0 %v2565_v19, %s2259_s28 }
 0x3eb   : > { %v932_v14 = vpop.xlane.xlu0 %931 }
 0x3ec   : > { %2077 = vrcp.f32 %v932_v14 }
 0x3f6   : > { %v2078_v15 = vpop.eup %2077 }
 0x3f7   : > { %v943_v16 = vmul.f32 %v2078_v15, %v2070_v55 }
 0x3f9   : > { %v950_v17 = vpack.c.bf16 %v943_v16, %v943_v16 }
 0x3fb   : > { %1900 = vmatmul.mubr.msk.bf16.vlgmr.msra.gmra.mrb[12].mxu1 %vm708_vm3, %v950_v17 }
 0x3fc   : > { %1911 = vmatprep.mubr.msk.bf16.mxu1 %vm2254_vm1, %v2253_v5 }
 0x450   : > { %v935_v18 = vpop.xlane.xlu1 %934 }
 0x451   : > { %2079 = vrcp.f32 %v935_v18 }
 0x454   : > { %v938_v21 = vpop.xlane.xlu0 %937 }
 0x455   : > { %2081 = vrcp.f32 %v938_v21 }
 0x458   : > { %v941_v22 = vpop.xlane.xlu1 %940  ;;  %v1100_v24 = vpop.permute.xlu0 %1099 }
 0x459   : > { %2083 = vrcp.f32 %v941_v22  ;;  %v1105_v30 = vsel %vm959_vm4, %v1100_v24, 0 }
 0x45b   : > { %v2080_v20 = vpop.eup %2079 }
 0x45c   : > { %v945_v23 = vmul.f32 %v2080_v20, %v2072_v8  ;;  %v1052_v19 = vpop.permute.xlu1 %1051 }
 0x45d   : > { %v1057_v25 = vsel %vm959_vm4, %v1052_v19, 0 }
 0x45e   : > { %1910 = vmatpush3.bf16.msra.mxu1 %v1057_v25  ;;  %v951_v26 = vpack.c.bf16 %v945_v23, %v945_v23 }
 0x45f   : > { %v2082_v27 = vpop.eup %2081  ;;  %1921 = vmatprep.subr.bf16.mxu1 %v2253_v5 }
 0x460   : > { %v947_v29 = vmul.f32 %v2082_v27, %v2074_v10  ;;  %1906 = vmatmul.mubr.msk.bf16.vlgmr.msra.gmra.mrb[8].mxu0 %vm708_vm3, %v951_v26 }
 0x461   : > { %1916 = vmatpush3.bf16.msra.mxu0 %v1105_v30  ;;  %1917 = vmatprep.mubr.msk.bf16.mxu0 %vm2254_vm1, %v2253_v5  ;;  %v2063_v30 = vld [vmem:[%s2520_s22] sm:$0xff]  }
 0x462   : > { %v952_v31 = vpack.c.bf16 %v947_v29, %v947_v29  ;;  %1927 = vmatprep.subr.bf16.mxu0 %v2253_v5 }
 0x463   : > { %v2084_v33 = vpop.eup %2083 }
 0x464   : > { %v949_v35 = vmul.f32 %v2084_v33, %v2076_v12  ;;  %1912 = vmatmul.mubr.msk.bf16.vlgmr.msra.gmra.mrb[16].mxu1 %vm708_vm3, %v952_v31  ;;  %v2064_v31 = vld [vmem:[%s2520_s22 + $0x8] sm:$0xff]  }
 0x465   : > { %1922 = vmatpush3.bf16.msra.mxu1 %v1159_v32  ;;  %1923 = vmatprep.mubr.msk.bf16.mxu1 %vm2254_vm1, %v2253_v5  ;;  %v2066_v32 = vld [vmem:[%s2530_s19 + $0x8] sm:$0xff]  }
 0x466   : > { %v953_v36 = vpack.c.bf16 %v949_v35, %v949_v35  ;;  %1933 = vmatprep.subr.bf16.mxu1 %v2253_v5 }
 0x468   : > { %1918 = vmatmul.mubr.msk.bf16.vlgmr.msra.gmra.mrb[12].mxu0 %vm708_vm3, %v953_v36 }
 0x469   : > { %1928 = vmatpush3.bf16.msra.mxu0 %v1205_v37  ;;  %1929 = vmatprep.mubr.msk.bf16.mxu0 %vm2254_vm1, %v2253_v5  ;;  %v1807_v37 = vld [vmem:[%s2828_s16] ss:$0 sm:$0xff] }
 0x46a   : > { %1939 = vmatprep.subr.bf16.mxu0 %v2253_v5 }
 0x4ce   : > { %v997_v39 = vpop.f32.mrb[12].mxu1 }
 0x4cf   : > { %v1147_v40 = vpack.c.bf16 %v997_v39, %v997_v39  ;;  %v1901_v41 = vpop.f32.mrb[13].mxu1  ;;  %v1808_v39 = vld [vmem:[%s2829_s10] ss:$0 sm:$0xff] }
 0x4d0   : > { %v1000_v43 = vpop.f32.mrb[14].mxu1 }
 0x4d1   : > { %v1902_v44 = vpop.f32.mrb[15].mxu1  ;;  %1924 = vmatmul.mubr.msk.bf16.vlgmr.msra.gmra.mrb[20].mxu1 %vm708_vm3, %v1147_v40  ;;  %v2067_v43 = vld [vmem:[%s2530_s19 + $0x10] sm:$0xff]  }
 0x4d2   : > { %1934 = vmatpush3.bf16.msra.mxu1 %v1251_v42  ;;  %1935 = vmatprep.mubr.msk.bf16.mxu1 %vm2254_vm1, %v2253_v5  ;;  %v2068_v44 = vld [vmem:[%s2530_s19 + $0x18] sm:$0xff]  }
 0x4d3   : > { %1945 = vmatprep.subr.bf16.mxu1 %v2253_v5 }
 0x533   : > { %v1045_v46 = vpop.f32.mrb[8].mxu0 }
 0x534   : > { %v1148_v47 = vpack.c.bf16 %v1045_v46, %v1045_v46  ;;  %v1907_v48 = vpop.f32.mrb[9].mxu0 }
 0x535   : > { %v1048_v50 = vpop.f32.mrb[10].mxu0 }
 0x536   : > { %v1908_v51 = vpop.f32.mrb[11].mxu0  ;;  %1930 = vmatmul.mubr.msk.bf16.vlgmr.msra.gmra.mrb[16].mxu0 %vm708_vm3, %v1148_v47 }
 0x537   : > { %v1093_v52 = vpop.f32.mrb[16].mxu1  ;;  %1940 = vmatpush3.bf16.msra.mxu0 %v1297_v49  ;;  %1941 = vmatprep.mubr.msk.bf16.mxu0 %vm2254_vm1, %v2253_v5 }
 0x538   : > { %v1149_v53 = vpack.c.bf16 %v1093_v52, %v1093_v52  ;;  %v1913_v54 = vpop.f32.mrb[17].mxu1  ;;  %1953 = vmatprep.subr.bf16.mxu0 %v2253_v5 }
 0x539   : > { %v1096_v55 = vpop.f32.mrb[18].mxu1 }
 0x53a   : > { %v1914_v56 = vpop.f32.mrb[19].mxu1  ;;  %1936 = vmatmul.mubr.msk.bf16.vlgmr.msra.gmra.mrb[24].mxu1 %vm708_vm3, %v1149_v53 }
 0x53b   : > { %v1141_v57 = vpop.f32.mrb[12].mxu0  ;;  %1949 = vmatprep.mubr.msk.bf16.mxu1 %vm2254_vm1, %v2253_v5  ;;  %1946 = vmatpush3.bf16.msra.mxu1 %v2063_v30 }
 0x53c   : > { %v1150_v58 = vpack.c.bf16 %v1141_v57, %v1141_v57  ;;  %v1919_v59 = vpop.f32.mrb[13].mxu0  ;;  %1947 = vmatprep.subr.bf16.mxu1 %v2253_v5 }
 0x53d   : > { %v1144_v60 = vpop.f32.mrb[14].mxu0 }
 0x53e   : > { %v1920_v61 = vpop.f32.mrb[15].mxu0  ;;  %1942 = vmatmul.mubr.msk.bf16.vlgmr.msra.gmra.mrb[20].mxu0 %vm708_vm3, %v1150_v58 }
 0x53f   : > { %1961 = vmatprep.mubr.msk.bf16.mxu0 %vm2254_vm1, %v2253_v5  ;;  %1948 = vmatpush3.bf16.msra.mxu1 %v2064_v31 }
 0x5a4   : > { %v1195_v62 = vpop.f32.mrb[20].mxu1 }
 0x5a5   : > { %v1925_v63 = vpop.f32.mrb[21].mxu1  ;;  %v1339_v3 = vsel %vm647_vm2, %v1195_v62, 0.0 }
 0x5a6   : > { %v1198_v0 = vpop.f32.mrb[22].mxu1 }
 0x5a7   : > { %v1926_v1 = vpop.f32.mrb[23].mxu1 }
 0x609   : > { %v1241_v2 = vpop.f32.mrb[16].mxu0 }
 0x60a   : > { %v1340_v4 = vsel %vm647_vm2, %v1241_v2, 0.0  ;;  %v1931_v6 = vpop.f32.mrb[17].mxu0 }
 0x60b   : > { %v1341_v8 = vadd.f32 %v1340_v4, %v1339_v3  ;;  %v1244_v9 = vpop.f32.mrb[18].mxu0  ;;  %v1819_v6 = vld [vmem:[%s614_s23] ss:$0 sm:$0xff] }
 0x60c   : > { %v1932_v10 = vpop.f32.mrb[19].mxu0  ;;  %v1820_v9 = vld [vmem:[%s617_s21] ss:$0 sm:$0xff] }
 0x60d   : > { %v1287_v11 = vpop.f32.mrb[24].mxu1 }
 0x60e   : > { %v1342_v12 = vsel %vm647_vm2, %v1287_v11, 0.0  ;;  %v1937_v13 = vpop.f32.mrb[25].mxu1 }
 0x60f   : > { %v1343_v14 = vadd.f32 %v1342_v12, %v1341_v8  ;;  %v1290_v15 = vpop.f32.mrb[26].mxu1 }
 0x610   : > { %v1938_v16 = vpop.f32.mrb[27].mxu1 }
 0x611   : > { %v1333_v17 = vpop.f32.mrb[20].mxu0 }
 0x612   : > { %v1344_v18 = vsel %vm647_vm2, %v1333_v17, 0.0  ;;  %v1943_v21 = vpop.f32.mrb[21].mxu0 }
 0x613   : > { %v1345_v22 = vadd.f32 %v1344_v18, %v1343_v14  ;;  %v1336_v20 = vpop.f32.mrb[22].mxu0 }
 0x614   : > { %v1944_v23 = vpop.f32.mrb[23].mxu0 }
 0x615   : > { %v1346_v19 = vadd.f32 %v1345_v22, %v2551_v7  ;;  %v2065_v7 = vld [vmem:[%s2530_s19] sm:$0xff]  }
 0x616   : > { %1954 = vmatpush3.bf16.msra.mxu0 %v2065_v7 }
 0x617   : > { %v1349_v24 = vsel %vm647_vm2, %v1346_v19, 0.0  ;;  %1955 = vmatprep.subr.bf16.mxu0 %v2253_v5 }
 0x618   : > { %1350 = vadd.xlane.f32.xlu1 %v1349_v24 }
 0x61a   : > { %1956 = vmatpush3.bf16.msra.mxu0 %v2066_v32 }
 0x61b   : > { %1957 = vmatprep.subr.bf16.mxu0 %v2253_v5 }
 0x61e   : > { %1958 = vmatpush3.bf16.msra.mxu0 %v2067_v43 }
 0x61f   : > { %1959 = vmatprep.subr.bf16.mxu0 %v2253_v5  ;;  %v1813_v5 = vld [vmem:[%s611_s0] ss:$0 sm:$0xff] }
 0x622   : > { %1960 = vmatpush3.bf16.msra.mxu0 %v2068_v44 }
 0x6a5   : > { %v1351_v25 = vpop.xlane.xlu1 %1350 }
 0x6a6   : > { %v1353_v26 = vmul.f32 0.03125, %v1351_v25 }
 0x6a8   : > { %v1354_v27 = vsub.f32 %v1346_v19, %v1353_v26 }
 0x6aa   : > { %v1355_v28 = vmul.f32 %v1354_v27, %v1354_v27 }
 0x6ac   : > { %v1356_v29 = vsel %vm647_vm2, %v1355_v28, 0.0 }
 0x6ad   : > { %1357 = vadd.xlane.f32.xlu0 %v1356_v29 }
 0x73a   : > { %v1358_v33 = vpop.xlane.xlu0 %1357 }
 0x73b   : > { %v1359_v34 = vmul.f32 0.03125, %v1358_v33 }
 0x73d   : > { %v1360_v35 = vadd.f32 1e-05, %v1359_v34 }
 0x73f   : > { %2085 = vrsqrt.f32 %v1360_v35 }
 0x749   : > { %v2086_v36 = vpop.eup %2085 }
 0x74a   : > { %v1362_v38 = vmul.f32 %v2086_v36, %v1354_v27 }
 0x74c   : > { %v1369_v40 = vmul.f32 %v1807_v37, %v1362_v38 }
 0x74e   : > { %v1376_v41 = vadd.f32 %v1808_v39, %v1369_v40 }
 0x750   : > { %v1377_v42 = vpack.c.bf16 %v1376_v41, %v1376_v41 }
 0x752   : > { %1950 = vmatmul.mubr.msk.bf16.vlgmr.msra.gmra.mrb[28].mxu1 %vm647_vm2, %v1377_v42 }
 0x825   : > { %v1438_v46 = vpop.f32.mrb[28].mxu1 }
 0x826   : > { %v1439_v47 = vadd.f32 %v1809_v45, %v1438_v46  ;;  %v1951_v48 = vpop.f32.mrb[29].mxu1 }
 0x827   : > { %v1441_v49 = vpop.f32.mrb[30].mxu1 }
 0x828   : > { %v1444_v50 = vmax.f32 %v1439_v47, 0.0  ;;  %v1952_v51 = vpop.f32.mrb[31].mxu1 }
 0x82a   : > { %v1445_v52 = vpack.c.bf16 %v1444_v50, %v1444_v50 }
 0x82c   : > { %1962 = vmatmul.mubr.msk.bf16.vlgmr.msra.gmra.mrb[24].mxu0 %vm1485_vm5, %v1445_v52 }
 0x8ff   : > { %v1523_v53 = vpop.f32.mrb[24].mxu0 }
 0x900   : > { %v1524_v54 = vadd.f32 %v1813_v5, %v1523_v53  ;;  %v1963_v55 = vpop.f32.mrb[25].mxu0 }
 0x901   : > { %v1526_v56 = vpop.f32.mrb[26].mxu0 }
 0x902   : > { %v1964_v57 = vpop.f32.mrb[27].mxu0  ;;  %v1529_v58 = vadd.f32 %v1524_v54, %v1376_v41 }
 0x904   : > { %v1532_v59 = vsel %vm647_vm2, %v1529_v58, 0.0 }
 0x905   : > { %1533 = vadd.xlane.f32.xlu0 %v1532_v59 }
 0x992   : > { %v1534_v60 = vpop.xlane.xlu0 %1533 }
 0x993   : > { %v1535_v61 = vmul.f32 0.03125, %v1534_v60 }
 0x995   : > { %v1536_v62 = vsub.f32 %v1529_v58, %v1535_v61 }
 0x997   : > { %v1537_v63 = vmul.f32 %v1536_v62, %v1536_v62 }
 0x999   : > { %v1538_v0 = vsel %vm647_vm2, %v1537_v63, 0.0 }
 0x99a   : > { %1539 = vadd.xlane.f32.xlu1 %v1538_v0 }
 0xa27   : > { %v1540_v1 = vpop.xlane.xlu1 %1539 }
 0xa28   : > { %v1541_v2 = vmul.f32 0.03125, %v1540_v1 }
 0xa2a   : > { %v1542_v3 = vadd.f32 1e-05, %v1541_v2 }
 0xa2c   : > { %2087 = vrsqrt.f32 %v1542_v3 }
 0xa36   : > { %v2088_v4 = vpop.eup %2087 }
 0xa37   : > { %v1544_v8 = vmul.f32 %v2088_v4, %v1536_v62  ;;  %1563 = sbr.rel (%p1821_p12) target bundleno = 2622 (0xa3e), region = 84 }
 0xa39   : > { %v1551_v10 = vmul.f32 %v1819_v6, %v1544_v8 }
 0xa3b   : > { %v1558_v11 = vadd.f32 %v1820_v9, %v1551_v10 }
 0xa3d   : > { %1559 = vst.msk [vmem:[#allocation2] sm:$0xff] %vm647_vm2, %v1558_v11  ;;  %1564 = vst.msk [vmem:[%s2544_s17] sm:$0xff] (!%p1821_p12), %vm647_vm2, %v1558_v11 }
 0xa3e PF: > { %s2832_s3 = sld [smem:[#allocation15_spill]]  ;;  %s2834_s1 = sld [smem:[#allocation31_spill]] }
 0xa3f   : > { %s1579_s22 = sshll.u32 %s2544_s17, 4  ;;  %s1566_s18 = scalar_lea.sflag [#allocation5], %s2484_s30  ;;  %s1580_s22 = int_to_ptr.vmem [resolvable:$true] %s1579_s22 }
 0xa40   : > { %s2147_s16 = scalar_lea.vmem %s1580_s22, 128  ;;  %s2260_s24 = smov [#allocation8]  }
 0xa41   : > { %p2148_p13 = scmp.ne.s32.totalorder %s1580_s22, %s2147_s16  ;;  %s2151_s11 = sshll.u32 %s2260_s24, 4  ;;  %s2152_s11 = int_to_ptr.vmem [resolvable:$false] %s2151_s11 }
 0xa42   : > { %s2153_s25 = scalar_lea.vmem %s2152_s11, 256  ;;  %p2154_p7 = scmp.lt.s32.totalorder %s1580_s22, %s2152_s11 }
 0xa43   : > { %p2149_p10 = pnand %p2148_p13, %p2429_p6  ;;  %p2155_p11 = scmp.lt.s32.totalorder %s2153_s25, %s2147_s16 }
 0xa44   : > { %s1823_s6 = sshll.u32 %s2832_s3, 7 }
 0xa45   : > { %s2711_s21 = scalar_lea.hbm %s2834_s1, %s1823_s6  ;;  %p2150_p3 = pneg %p2149_p10 }
 0xa46   : > { %p2156_p1 = por %p2155_p11, %p2154_p7 }
 0xa48   : > { %p2157_p2 = pnand %p2156_p1, %p2150_p3 }
 0xa4a   : > { %2160 = shalt.err (!%p2157_p2)
}
 0xa4b   : > { %s2161_s30 = scalar_lea.hbm %s2711_s21, 128  ;;  %s2165_s13 = scalar_lea.hbm %s2834_s1, 256 }
 0xa4c   : > { %p2162_p9 = scmp.ne.s32.totalorder %s2711_s21, %s2161_s30  ;;  %p2166_p0 = scmp.lt.u32.totalorder %s2711_s21, %s2834_s1 }
 0xa4d   : > { %p2167_p8 = scmp.lt.u32.totalorder %s2165_s13, %s2161_s30  ;;  %p2169_p13 = scmp.lt.u32.totalorder %s2161_s30, %s2711_s21 }
 0xa4e   : > { %p2163_p5 = pnand %p2162_p9, %p2429_p6 }
 0xa4f   : > { %p2168_p12 = por %p2167_p8, %p2166_p0 }
 0xa50   : > { %p2164_p4 = pneg %p2163_p5 }
 0xa51   : > { %p2170_p10 = por %p2169_p13, %p2168_p12 }
 0xa53   : > { %p2171_p3 = pnand %p2170_p10, %p2164_p4 }
 0xa55   : > { %2174 = shalt.err (!%p2171_p3)
}
 0xa56   : > { %1971 = dma.vmem_to_hbm [thread:$0]  (%p2429_p6), %s1580_s22, 128, %s2711_s21, %s1566_s18  }
 0xa57 PF: > { %s2835_s27 = sld [smem:[#allocation18_spill]]  ;;  %s2836_s14 = sld [smem:[#allocation12_spill]] }
 0xa58   : > { %s2837_s19 = sld [smem:[#allocation19_spill]] }
 0xa5d   : > { %p1988_p7 = scmp.ge.s32.totalorder %s2835_s27, 2  ;;  %s1591_s0 = sand.u32 1, %s2836_s14  }
 0xa5e   : > { %p2838_p11 = scmp.ne.s32.totalorder %s2837_s19, 0  ;;  %s1592_s29 = scalar_lea.sflag [#allocation5], %s1591_s0 }
 0xa60   : > { %p1982_p1 = pnand %p1988_p7, %p2838_p11 }
 0xa62   : > { %2216 = dma.done.wait (!%p1982_p1), %s1592_s29, 128  }
 0xa63   : > { %2218 = vsyncadd (!%p1982_p1), %s1592_s29, 4294967168  ;;  %s29_s28 = sadd.s32 1, %s2835_s27   ;;  %s2839_s21 = sld [smem:[#allocation13_spill]] }
 0xa64   : > { %p26_p2 = scmp.ge.s32.totalorder %s29_s28, 6   ;;  %s2840_s22 = sld [smem:[#allocation14_spill]] }
 0xa65   : > { %s2841_s23 = sld [smem:[#allocation23_spill]]  ;;  %s2842_s24 = sld [smem:[#allocation16_spill]] }
 0xa66   : > { %s2843_s25 = sld [smem:[#allocation17_spill]]  ;;  %s2844_s26 = sld [smem:[#allocation20_spill]] }
 0xa67   : > { %s2845_s27 = sld [smem:[#allocation22_spill]]  ;;  %28 = sbr.rel (!%p26_p2) target bundleno = 17 (0x11), region = 155 }
 0xa6e   :  { %1597 = vsyncpa [#allocation4], 1 }
 0xa6f   :  { %1599 = vsyncpa [#allocation4 + $0x1], 1 }
 0xa70   :  { %1600 = vsyncpa [#allocation7], 1 }
 0xa71   :  { %1601 = vsyncpa [#allocation5], 1 }
 0xa72   :  { %1603 = vsyncpa [#allocation5 + $0x1], 1 }

</bundles_post_ra>
